<compile_context>
chip_gen: v7x
topology: tpu7x:2x2x1
jax: 0.10.0
libtpu: 0.0.40
codegen_flags: <defaults>
</compile_context>

<pallas_src>
import functools

import jax
import jax.numpy as jnp
from jax.experimental import pallas as pl
from jax.experimental.pallas import tpu as pltpu


def _lora_kernel(w_ref, b_ref, a_ref, o_ref, *, scale):
    """One (tm, tn) output tile: o = w + (b @ a) * scale."""
    delta = jnp.dot(b_ref[...], a_ref[...],
                    preferred_element_type=jnp.float32)
    o_ref[...] = (w_ref[...] + delta * scale).astype(o_ref.dtype)


def lora_parametrize(original_weights, lora_B, lora_A, *, alpha, rank,
                     enabled=True, tm=None, tn=None):
    """Applies the LoRA delta to the weight matrix with a tiled Pallas kernel.

    original_weights: (features_in, features_out) float32
    lora_B:           (features_in, rank)         float32
    lora_A:           (rank, features_out)        float32
    """
    if not enabled:
        # Disabled path is a no-op in the PyTorch module; returning the input
        # is free and avoids a full HBM read+write of W.
        return original_weights

    M, N = original_weights.shape
    r = lora_B.shape[1]
    assert lora_A.shape == (r, N)
    scale = alpha / rank

    # Large, lane-dense tiles (mem-bound kernel): clamp to the array dims for
    # small weights, otherwise use up to 512 x 2048 f32 (4 MiB per W tile).
    if tm is None:
        tm = M if M <= 512 else 512
    if tn is None:
        tn = N if N <= 2048 else 2048
    # (8, 128) tiling constraint: block dims must be multiples of (8, 128)
    # unless they equal the full array dim (edge blocks are padded/masked).
    if tm != M:
        assert tm % 8 == 0, "tm must be a multiple of 8 (or equal M)"
    if tn != N:
        assert tn % 128 == 0, "tn must be a multiple of 128 (or equal N)"

    grid = (pl.cdiv(M, tm), pl.cdiv(N, tn))

    # VMEM budget: double-buffered W-in and W-out tiles dominate; the B/A
    # strips are tiny for realistic ranks.  Stay under v7x's 64 MiB physical.
    w_tile_bytes = tm * tn * 4
    ab_tile_bytes = (tm * r + r * tn) * 4
    vmem_needed = 2 * 2 * w_tile_bytes + 2 * ab_tile_bytes
    vmem_limit = min(max(vmem_needed + (8 << 20), 32 << 20), 56 << 20)

    kernel = functools.partial(_lora_kernel, scale=scale)

    return pl.pallas_call(
        kernel,
        out_shape=jax.ShapeDtypeStruct((M, N), original_weights.dtype),
        grid_spec=pltpu.PrefetchScalarGridSpec(
            num_scalar_prefetch=0,
            grid=grid,
            in_specs=[
                pl.BlockSpec((tm, tn), lambda i, j: (i, j)),   # W tile
                pl.BlockSpec((tm, r), lambda i, j: (i, 0)),    # lora_B rows (full rank)
                pl.BlockSpec((r, tn), lambda i, j: (0, j)),    # lora_A cols (full rank)
            ],
            out_specs=pl.BlockSpec((tm, tn), lambda i, j: (i, j)),
        ),
        compiler_params=pltpu.CompilerParams(
            dimension_semantics=("parallel", "parallel"),
            vmem_limit_bytes=vmem_limit),
    )(original_weights, lora_B, lora_A)


if __name__ == "__main__":
    # Small, deterministic setup consistent with the module's __init__.
    features_in, features_out, rank, alpha = 32, 128, 8, 4

    key = jax.random.PRNGKey(0)
    k_w, k_a, k_b, k_w2, k_b2 = jax.random.split(key, 5)

    # Original (pre-LoRA) weight matrix being parametrized.
    original_weights = jax.random.normal(
        k_w, (features_in, features_out), dtype=jnp.float32)

    # Module init: lora_B = zeros, lora_A ~ Normal(0, 1).
    lora_B = jnp.zeros((features_in, rank), dtype=jnp.float32)
    lora_A = jax.random.normal(k_a, (rank, features_out), dtype=jnp.float32)

    out = lora_parametrize(original_weights, lora_B, lora_A,
                           alpha=alpha, rank=rank, enabled=True)
    out = jax.block_until_ready(out)

    # Reference check (plain JAX), mirrors the PyTorch forward exactly.
    ref = original_weights + (lora_B @ lora_A).reshape(
        original_weights.shape) * (alpha / rank)
    assert jnp.allclose(out, ref, atol=1e-5, rtol=1e-5)

    # Non-trivial delta (non-zero lora_B) at the small shape.
    lora_B_nz = jax.random.normal(k_b, (features_in, rank), dtype=jnp.float32)
    out2 = jax.block_until_ready(
        lora_parametrize(original_weights, lora_B_nz, lora_A,
                         alpha=alpha, rank=rank, enabled=True))
    ref2 = original_weights + (lora_B_nz @ lora_A).reshape(
        original_weights.shape) * (alpha / rank)
    assert jnp.allclose(out2, ref2, atol=1e-4, rtol=1e-4)

    # Disabled path: pure pass-through, no kernel launch.
    out_disabled = lora_parametrize(original_weights, lora_B_nz, lora_A,
                                    alpha=alpha, rank=rank, enabled=False)
    assert out_disabled is original_weights

    # Larger shape to exercise the tiled multi-block grid (still quick).
    M2, N2 = 1024, 2048
    W_big = jax.random.normal(k_w2, (M2, N2), dtype=jnp.float32)
    B_big = jax.random.normal(k_b2, (M2, rank), dtype=jnp.float32)
    A_big = jax.random.normal(k_a, (rank, N2), dtype=jnp.float32)
    out3 = jax.block_until_ready(
        lora_parametrize(W_big, B_big, A_big, alpha=alpha, rank=rank,
                         enabled=True))
    ref3 = W_big + (B_big @ A_big) * (alpha / rank)
    assert jnp.allclose(out3, ref3, atol=1e-3, rtol=1e-4)

    print("KERNEL_OK")
</pallas_src>

<mosaic_0001>
module attributes {stable_mosaic.version = 11 : i64} {
  func.func @_lora_kernel(%arg0: i32, %arg1: i32, %arg2: memref<32x128xf32, #tpu.memory_space<vmem>>, %arg3: memref<32x8xf32, #tpu.memory_space<vmem>>, %arg4: memref<8x128xf32, #tpu.memory_space<vmem>>, %arg5: memref<32x128xf32, #tpu.memory_space<vmem>>) attributes {dimension_semantics = [#tpu.dimension_semantics<parallel>, #tpu.dimension_semantics<parallel>], iteration_bounds = array<i64: 1, 1>, scalar_prefetch = 0 : i64, scratch_operands = 0 : i64, tpu.core_type = #tpu.core_type<tc>, window_params = [{transform_indices = @transform_0, window_bounds = array<i64: 32, 128>}, {transform_indices = @transform_1, window_bounds = array<i64: 32, 8>}, {transform_indices = @transform_2, window_bounds = array<i64: 8, 128>}, {transform_indices = @transform_3, window_bounds = array<i64: 32, 128>}]} {
    %c0 = arith.constant 0 : index
    %c0_0 = arith.constant 0 : index
    %0 = vector.load %arg3[%c0, %c0_0] : memref<32x8xf32, #tpu.memory_space<vmem>>, vector<32x8xf32>
    %c0_1 = arith.constant 0 : index
    %c0_2 = arith.constant 0 : index
    %1 = vector.load %arg4[%c0_1, %c0_2] : memref<8x128xf32, #tpu.memory_space<vmem>>, vector<8x128xf32>
    %cst = arith.constant dense<0.000000e+00> : vector<32x128xf32>
    %2 = tpu.matmul %0, %1, %cst {dimension_numbers = #tpu.dot_dimension_numbers<[1], [0], [0], [1], [0, 0, 1, 1], [], []>} : vector<32x8xf32>, vector<8x128xf32>, vector<32x128xf32> -> vector<32x128xf32>
    %c0_3 = arith.constant 0 : index
    %c0_4 = arith.constant 0 : index
    %3 = vector.load %arg2[%c0_3, %c0_4] : memref<32x128xf32, #tpu.memory_space<vmem>>, vector<32x128xf32>
    %cst_5 = arith.constant 5.000000e-01 : f32
    %4 = vector.broadcast %cst_5 : f32 to vector<32x128xf32>
    %5 = arith.mulf %2, %4 : vector<32x128xf32>
    %6 = arith.addf %3, %5 : vector<32x128xf32>
    %c0_6 = arith.constant 0 : index
    %c0_7 = arith.constant 0 : index
    %7 = vector.load %arg5[%c0_6, %c0_7] : memref<32x128xf32, #tpu.memory_space<vmem>>, vector<32x128xf32>
    tpu.vector_store %arg5[%c0_6, %c0_7], %6 {strides = array<i32>} : memref<32x128xf32, #tpu.memory_space<vmem>>, vector<32x128xf32>,
    return
  }
  func.func @transform_0(%arg0: i32, %arg1: i32) -> (i32, i32) {
    %c0_i32 = arith.constant 0 : i32
    return %arg0, %arg1 : i32, i32
  }
  func.func @transform_1(%arg0: i32, %arg1: i32) -> (i32, i32) {
    %c0_i32 = arith.constant 0 : i32
    %c0_i32_0 = arith.constant 0 : i32
    return %arg0, %c0_i32 : i32, i32
  }
  func.func @transform_2(%arg0: i32, %arg1: i32) -> (i32, i32) {
    %c0_i32 = arith.constant 0 : i32
    %c0_i32_0 = arith.constant 0 : i32
    return %c0_i32, %arg1 : i32, i32
  }
  func.func @transform_3(%arg0: i32, %arg1: i32) -> (i32, i32) {
    %c0_i32 = arith.constant 0 : i32
    return %arg0, %arg1 : i32, i32
  }
}

</mosaic_0001>

<bundles_post_ra>
// kernel: tpu_custom_call.1
= control target key start
LH: loop header
LB: loop body
LE: loop exit
PB: predicated region body
PF: predicated region fallthrough
CT: control target
= control target key end

     0   :  { %vm20_vm0 = vcmask 64512   ;;  %s258_s0 = inlined_call_operand.vmem [shape: f32[32,128], index: 0, kind: input, shape index: {}]   ;;  %s259_s1 = inlined_call_operand.vmem [shape: f32[32,8], index: 1, kind: input, shape index: {}]   ;;  %s260_s2 = inlined_call_operand.vmem [shape: f32[8,128], index: 2, kind: input, shape index: {}]   ;;  %s261_s3 = inlined_call_operand.hbm [shape: f32[32,128], index: 3, kind: output, shape index: {}]  }
   0x1   :  { %v19_v0 = vld [vmem:[%s260_s2] sm:$0xff]  ;;  %v17_v2 = vld [vmem:[%s259_s1 + $0x10] sm:$0xff]  ;;  %v16_v3 = vld [vmem:[%s259_s1 + $0x8] sm:$0xff] }
   0x2   :  { %v15_v1 = vld [vmem:[%s259_s1] sm:$0xff]  ;;  %159 = vmatprep.subr.mxu0 %v19_v0  ;;  %167 = vmatprep.subr.mxu1 %v19_v0  ;;  %v18_v4 = vld [vmem:[%s259_s1 + $0x18] sm:$0xff] }
   0x3   :  { %8 = vsyncpa [#allocation3], 0  ;;  %160 = vmatpush3.msra.mxu0 %v19_v0  ;;  %168 = vmatpush3.msra.mxu1 %v19_v0  ;;  %v119_v6 = vld [vmem:[%s258_s0 + $0x8] sm:$0xff]  ;;  %v121_v8 = vld [vmem:[%s258_s0 + $0x18] sm:$0xff]  ;;  %s196_s25 = smov [#allocation2]  }
   0x4   :  { %161 = vmatprep.mubr.msk.f32.mxu0 %vm20_vm0, %v15_v1  ;;  %164 = vmatprep.mubr.msk.f32.mxu1 %vm20_vm0, %v17_v2  ;;  %s139_s26 = sshll.u32 %s196_s25, 4  ;;  %v118_v12 = vld [vmem:[%s258_s0] sm:$0xff]  ;;  %v120_v14 = vld [vmem:[%s258_s0 + $0x10] sm:$0xff]  ;;  %s140_s26 = int_to_ptr.vmem [resolvable:$true] %s139_s26 }
   0x5   :  { %162 = vmatmul.mubr.msk.f32.vlgmr.msra.gmra.mrb[0].mxu0 %vm20_vm0, %v16_v3  ;;  %165 = vmatmul.mubr.msk.f32.vlgmr.msra.gmra.mrb[0].mxu1 %vm20_vm0, %v18_v4  ;;  %s172_s30 = scalar_lea.vmem %s140_s26, 512  ;;  %p177_p1 = scmp.lt.s32.totalorder %s140_s26, %s140_s26 }
   0x6   :  { %p173_p0 = scmp.ne.s32.totalorder %s140_s26, %s172_s30  ;;  %p178_p2 = scmp.lt.s32.totalorder %s172_s30, %s172_s30 }
   0x8   :  { %p179_p3 = por %p178_p2, %p177_p1 }
   0xa   :  { %p180_p4 = pnand %p179_p3, %p173_p0 }
  0xd8   :  { %v163_v5 = vpop.f32.mrb[0].mxu0  ;;  %v166_v7 = vpop.f32.mrb[0].mxu1 }
  0xd9   :  { %v123_v9 = vmul.f32 0.5, %v163_v5  ;;  %v125_v10 = vmul.f32 0.5, %v166_v7  ;;  %v99_v11 = vpop.f32.mrb[1].mxu0  ;;  %v109_v13 = vpop.f32.mrb[1].mxu1 }
  0xda   :  { %v122_v15 = vmul.f32 0.5, %v99_v11  ;;  %v124_v16 = vmul.f32 0.5, %v109_v13 }
  0xdb   :  { %v127_v17 = vadd.f32 %v123_v9, %v119_v6  ;;  %v129_v18 = vadd.f32 %v125_v10, %v121_v8 }
  0xdc   :  { %v126_v19 = vadd.f32 %v122_v15, %v118_v12  ;;  %v128_v20 = vadd.f32 %v124_v16, %v120_v14 }
  0xdd   :  { %131 = vst [vmem:[#allocation2 + $0x8] sm:$0xff] %v127_v17  ;;  %133 = vst [vmem:[#allocation2 + $0x18] sm:$0xff] %v129_v18 }
  0xde   :  { %130 = vst [vmem:[#allocation2] sm:$0xff] %v126_v19  ;;  %132 = vst [vmem:[#allocation2 + $0x10] sm:$0xff] %v128_v20 }
  0xdf   :  { %183 = shalt.err (!%p180_p4)
}
  0xe0   :  { %s184_s5 = scalar_lea.hbm %s261_s3, 512 }
  0xe1   :  { %p185_p5 = scmp.ne.s32.totalorder %s261_s3, %s184_s5  ;;  %p188_p6 = scmp.lt.u32.totalorder %s184_s5, %s261_s3 }
  0xe3   :  { %p190_p7 = pnand %p188_p6, %p185_p5 }
  0xe5   :  { %193 = shalt.err (!%p190_p7)
}
  0xe6   :  { %s197_s10 = smov 128   ;;  %s198_s11 = smov 8  }
  0xe7   :  { %145 = dma.vmem_to_hbm [thread:$0]  %s140_s26, 512, %s261_s3, [#allocation3], %s197_s10, %s197_s10, %s198_s11  }
  0xe8   :  { %194 = dma.done.wait [#allocation3], 512  }
  0xe9   :  { %195 = vsyncadd [#allocation3], 4294966784 }
  0xea   :  { %149 = vsyncpa [#allocation3], 1 }

</bundles_post_ra>
